<compile_context>
chip_gen: v6e
topology: v6e:2x2x1
jax: 0.10.0
libtpu: 0.0.40
codegen_flags: <defaults>
</compile_context>

<pallas_src>
import jax
import jax.numpy as jnp
from jax.experimental import pallas as pl
from jax.experimental.pallas import tpu as pltpu

# Logical sizes (PyTorch module) and padded (TPU-friendly) sizes.
IN_F, HID_F, OUT_F = 5, 100, 5
IN_P, HID_P, OUT_P = 8, 128, 8   # input -> 8 lanes, hidden -> 128 lanes, output -> 8 lanes


def _round_up(n, m):
    return ((n + m - 1) // m) * m


def mlp_kernel(x_ref, w1_ref, b1_ref, w2_ref, b2_ref, w3_ref, b3_ref, o_ref):
    x = x_ref[...]                      # (TB, 8)  f32
    w1 = w1_ref[...]                    # (8, 128) f32

    # ----- Layer 1 on the VPU: K=5 is tiny, so 5 broadcast multiply-adds beat an
    # MXU pass that would pad K to 128 (~6% array utilization).  Static unroll.
    h1 = x[:, 0:1] * w1[0:1, :]                       # (TB,1)*(1,128) -> (TB,128)
    for k in range(1, IN_F):
        h1 = h1 + x[:, k:k + 1] * w1[k:k + 1, :]
    h1 = jnp.maximum(h1 + b1_ref[...], 0.0)           # bias + ReLU in f32

    # ----- Layers 2 & 3 on the MXU: bf16 operands, f32 accumulation.
    h2 = jnp.dot(h1.astype(jnp.bfloat16), w2_ref[...],
                 preferred_element_type=jnp.float32) + b2_ref[...]
    h2 = jnp.maximum(h2, 0.0)                         # (TB, 128) f32

    out = jnp.dot(h2.astype(jnp.bfloat16), w3_ref[...],
                  preferred_element_type=jnp.float32) + b3_ref[...]
    o_ref[...] = out.astype(o_ref.dtype)              # (TB, 8) -- 32 B/row writeback


def _pad2(a, rows, cols):
    """Zero-pad a 2-D array up to (rows, cols) (exact through bias + ReLU)."""
    return jnp.pad(a, ((0, rows - a.shape[0]), (0, cols - a.shape[1])))


def _choose_batch_tile(B, block_batch):
    # Enough tiles to respect block_batch, and >= 2 tiles whenever the batch is big
    # enough so dimension_semantics=("parallel",) can shard across both v7x TCs
    # (one extra ~0.35us grid step on single-TC chips is noise).
    min_tiles = 2 if B >= 16 else 1
    n_tiles = max(pl.cdiv(B, block_batch), min_tiles)
    # Waste-aware tile size: hug B so padded tail rows are < 8 per tile.
    return _round_up(pl.cdiv(B, n_tiles), 8)


def ball_wall_detect_net(x, params, *, block_batch=2048):
    """Forward pass. x: (B, 5) f32; params: (in, out)-convention weights + (1, out) biases."""
    w1, b1, w2, b2, w3, b3 = params
    B = x.shape[0]

    tb = _choose_batch_tile(B, block_batch)
    b_pad = _round_up(B, tb)
    grid = (b_pad // tb,)

    # Zero-pad operands to lane/sublane-aligned shapes.
    #   x stays f32 (consumed by the VPU layer-1; v5e VPU has no bf16).
    #   w2/w3 go to bf16 for the MXU; biases stay f32 for the VALU adds.
    x_p = jnp.pad(x, ((0, b_pad - B), (0, IN_P - IN_F)))                       # (b_pad, 8) f32
    w1_p = _pad2(w1, IN_P, HID_P)                                              # (8, 128)  f32
    b1_p = _pad2(b1, 1, HID_P)                                                 # (1, 128)  f32
    w2_p = _pad2(w2, HID_P, HID_P).astype(jnp.bfloat16)                        # (128,128) bf16
    b2_p = _pad2(b2, 1, HID_P)                                                 # (1, 128)  f32
    w3_p = _pad2(w3, HID_P, OUT_P).astype(jnp.bfloat16)                        # (128, 8)  bf16
    b3_p = _pad2(b3, 1, OUT_P)                                                 # (1, 8)    f32

    # Moving batch tiles for x / out; weights & biases VMEM-resident (constant index_map,
    # so they are DMA'd once and reused across all grid steps).
    x_spec = pl.BlockSpec((tb, IN_P), lambda i: (i, 0))
    o_spec = pl.BlockSpec((tb, OUT_P), lambda i: (i, 0))
    w1_spec = pl.BlockSpec((IN_P, HID_P), lambda i: (0, 0))
    b1_spec = pl.BlockSpec((1, HID_P), lambda i: (0, 0))
    w2_spec = pl.BlockSpec((HID_P, HID_P), lambda i: (0, 0))
    b2_spec = pl.BlockSpec((1, HID_P), lambda i: (0, 0))
    w3_spec = pl.BlockSpec((HID_P, OUT_P), lambda i: (0, 0))
    b3_spec = pl.BlockSpec((1, OUT_P), lambda i: (0, 0))

    # Advisory cost hint reflecting the real padded HBM traffic and logical FLOPs.
    flops = 2 * B * (IN_F * HID_F + HID_F * HID_F + HID_F * OUT_F)
    weight_bytes = sum(int(p.size) * p.dtype.itemsize
                       for p in (w1_p, b1_p, w2_p, b2_p, w3_p, b3_p))
    bytes_accessed = b_pad * IN_P * 4 + b_pad * OUT_P * 4 + weight_bytes
    cost = pl.CostEstimate(flops=flops, transcendentals=0,
                           bytes_accessed=bytes_accessed)

    out_p = pl.pallas_call(
        mlp_kernel,
        out_shape=jax.ShapeDtypeStruct((b_pad, OUT_P), jnp.float32),
        grid=grid,
        in_specs=[x_spec, w1_spec, b1_spec, w2_spec, b2_spec, w3_spec, b3_spec],
        out_specs=o_spec,
        compiler_params=pltpu.CompilerParams(
            dimension_semantics=("parallel",)),
        cost_estimate=cost,
    )(x_p, w1_p, b1_p, w2_p, b2_p, w3_p, b3_p)

    # Slice away batch + feature padding outside the kernel.
    return out_p[:B, :OUT_F]


def init_params(key):
    """Deterministic init mirroring PyTorch nn.Linear default: U(-1/sqrt(fan_in), ...)."""
    def linear(key, fan_in, fan_out):
        kw, kb = jax.random.split(key)
        bound = 1.0 / jnp.sqrt(jnp.float32(fan_in))
        # stored as (in, out) so the kernel computes x @ W + b
        w = jax.random.uniform(kw, (fan_in, fan_out), jnp.float32, -bound, bound)
        b = jax.random.uniform(kb, (1, fan_out), jnp.float32, -bound, bound)
        return w, b

    k1, k2, k3 = jax.random.split(key, 3)
    w1, b1 = linear(k1, IN_F, HID_F)
    w2, b2 = linear(k2, HID_F, HID_F)
    w3, b3 = linear(k3, HID_F, OUT_F)
    return (w1, b1, w2, b2, w3, b3)


def reference_forward(x, params):
    """Plain-JAX reference for sanity checking."""
    w1, b1, w2, b2, w3, b3 = params
    h1 = jnp.maximum(x @ w1 + b1, 0.0)
    h2 = jnp.maximum(h1 @ w2 + b2, 0.0)
    return h2 @ w3 + b3


if __name__ == "__main__":
    key = jax.random.PRNGKey(0)
    k_params, k_x1, k_x2 = jax.random.split(key, 3)
    params = init_params(k_params)

    # Tolerance is loose because layers 2/3 run bf16 on the MXU (f32 accumulation);
    # the plain-JAX reference itself also uses default (bf16-truncated) MXU precision.
    ATOL = RTOL = 3e-2

    # Small case (matches the module's toy usage): single-tile path.
    x_small = jax.random.normal(k_x1, (8, IN_F), dtype=jnp.float32)
    out_small = jax.block_until_ready(ball_wall_detect_net(x_small, params))
    ref_small = reference_forward(x_small, params)
    assert out_small.shape == (8, OUT_F)
    assert jnp.allclose(out_small, ref_small, atol=ATOL, rtol=RTOL)

    # Larger, non-tile-multiple batch: exercises the 2-step batch grid + padding/slicing.
    x_big = jax.random.normal(k_x2, (600, IN_F), dtype=jnp.float32)
    out_big = jax.block_until_ready(ball_wall_detect_net(x_big, params))
    ref_big = reference_forward(x_big, params)
    assert out_big.shape == (600, OUT_F)
    assert jnp.allclose(out_big, ref_big, atol=ATOL, rtol=RTOL)

    print("KERNEL_OK")
</pallas_src>

<mosaic_0001>
module attributes {stable_mosaic.version = 11 : i64} {
  func.func @mlp_kernel(%arg0: i32, %arg1: memref<8x8xf32, #tpu.memory_space<vmem>>, %arg2: memref<8x128xf32, #tpu.memory_space<vmem>>, %arg3: memref<1x128xf32, #tpu.memory_space<vmem>>, %arg4: memref<128x128xbf16, #tpu.memory_space<vmem>>, %arg5: memref<1x128xf32, #tpu.memory_space<vmem>>, %arg6: memref<128x8xbf16, #tpu.memory_space<vmem>>, %arg7: memref<1x8xf32, #tpu.memory_space<vmem>>, %arg8: memref<8x8xf32, #tpu.memory_space<vmem>>) attributes {dimension_semantics = [#tpu.dimension_semantics<parallel>], iteration_bounds = array<i64: 1>, scalar_prefetch = 0 : i64, scratch_operands = 0 : i64, tpu.core_type = #tpu.core_type<tc>, window_params = [{transform_indices = @transform_0, window_bounds = array<i64: 8, 8>}, {pipeline_mode = #tpu.pipeline_mode<synchronous>, transform_indices = @transform_1, window_bounds = array<i64: 8, 128>}, {pipeline_mode = #tpu.pipeline_mode<synchronous>, transform_indices = @transform_2, window_bounds = array<i64: 1, 128>}, {pipeline_mode = #tpu.pipeline_mode<synchronous>, transform_indices = @transform_3, window_bounds = array<i64: 128, 128>}, {pipeline_mode = #tpu.pipeline_mode<synchronous>, transform_indices = @transform_4, window_bounds = array<i64: 1, 128>}, {pipeline_mode = #tpu.pipeline_mode<synchronous>, transform_indices = @transform_5, window_bounds = array<i64: 128, 8>}, {pipeline_mode = #tpu.pipeline_mode<synchronous>, transform_indices = @transform_6, window_bounds = array<i64: 1, 8>}, {transform_indices = @transform_7, window_bounds = array<i64: 8, 8>}]} {
    %c0 = arith.constant 0 : index
    %c0_0 = arith.constant 0 : index
    %0 = vector.load %arg1[%c0, %c0_0] : memref<8x8xf32, #tpu.memory_space<vmem>>, vector<8x8xf32>
    %c0_1 = arith.constant 0 : index
    %c0_2 = arith.constant 0 : index
    %1 = vector.load %arg2[%c0_1, %c0_2] : memref<8x128xf32, #tpu.memory_space<vmem>>, vector<8x128xf32>
    %2 = vector.extract_strided_slice %0 {offsets = [0, 0], sizes = [8, 1], strides = [1, 1]} : vector<8x8xf32> to vector<8x1xf32>
    %3 = vector.extract_strided_slice %1 {offsets = [0, 0], sizes = [1, 128], strides = [1, 1]} : vector<8x128xf32> to vector<1x128xf32>
    %4 = vector.broadcast %2 : vector<8x1xf32> to vector<8x128xf32>
    %5 = vector.broadcast %3 : vector<1x128xf32> to vector<8x128xf32>
    %6 = arith.mulf %4, %5 : vector<8x128xf32>
    %7 = vector.extract_strided_slice %0 {offsets = [0, 1], sizes = [8, 1], strides = [1, 1]} : vector<8x8xf32> to vector<8x1xf32>
    %8 = vector.extract_strided_slice %1 {offsets = [1, 0], sizes = [1, 128], strides = [1, 1]} : vector<8x128xf32> to vector<1x128xf32>
    %9 = vector.broadcast %7 : vector<8x1xf32> to vector<8x128xf32>
    %10 = vector.broadcast %8 : vector<1x128xf32> to vector<8x128xf32>
    %11 = arith.mulf %9, %10 : vector<8x128xf32>
    %12 = arith.addf %6, %11 : vector<8x128xf32>
    %13 = vector.extract_strided_slice %0 {offsets = [0, 2], sizes = [8, 1], strides = [1, 1]} : vector<8x8xf32> to vector<8x1xf32>
    %14 = vector.extract_strided_slice %1 {offsets = [2, 0], sizes = [1, 128], strides = [1, 1]} : vector<8x128xf32> to vector<1x128xf32>
    %15 = vector.broadcast %13 : vector<8x1xf32> to vector<8x128xf32>
    %16 = vector.broadcast %14 : vector<1x128xf32> to vector<8x128xf32>
    %17 = arith.mulf %15, %16 : vector<8x128xf32>
    %18 = arith.addf %12, %17 : vector<8x128xf32>
    %19 = vector.extract_strided_slice %0 {offsets = [0, 3], sizes = [8, 1], strides = [1, 1]} : vector<8x8xf32> to vector<8x1xf32>
    %20 = vector.extract_strided_slice %1 {offsets = [3, 0], sizes = [1, 128], strides = [1, 1]} : vector<8x128xf32> to vector<1x128xf32>
    %21 = vector.broadcast %19 : vector<8x1xf32> to vector<8x128xf32>
    %22 = vector.broadcast %20 : vector<1x128xf32> to vector<8x128xf32>
    %23 = arith.mulf %21, %22 : vector<8x128xf32>
    %24 = arith.addf %18, %23 : vector<8x128xf32>
    %25 = vector.extract_strided_slice %0 {offsets = [0, 4], sizes = [8, 1], strides = [1, 1]} : vector<8x8xf32> to vector<8x1xf32>
    %26 = vector.extract_strided_slice %1 {offsets = [4, 0], sizes = [1, 128], strides = [1, 1]} : vector<8x128xf32> to vector<1x128xf32>
    %27 = vector.broadcast %25 : vector<8x1xf32> to vector<8x128xf32>
    %28 = vector.broadcast %26 : vector<1x128xf32> to vector<8x128xf32>
    %29 = arith.mulf %27, %28 : vector<8x128xf32>
    %30 = arith.addf %24, %29 : vector<8x128xf32>
    %c0_3 = arith.constant 0 : index
    %c0_4 = arith.constant 0 : index
    %31 = vector.load %arg3[%c0_3, %c0_4] : memref<1x128xf32, #tpu.memory_space<vmem>>, vector<1x128xf32>
    %32 = vector.broadcast %31 : vector<1x128xf32> to vector<8x128xf32>
    %33 = arith.addf %30, %32 : vector<8x128xf32>
    %cst = arith.constant 0.000000e+00 : f32
    %34 = vector.broadcast %cst : f32 to vector<8x128xf32>
    %35 = arith.maximumf %33, %34 : vector<8x128xf32>
    %36 = arith.truncf %35 : vector<8x128xf32> to vector<8x128xbf16>
    %c0_5 = arith.constant 0 : index
    %c0_6 = arith.constant 0 : index
    %37 = vector.load %arg4[%c0_5, %c0_6] : memref<128x128xbf16, #tpu.memory_space<vmem>>, vector<128x128xbf16>
    %cst_7 = arith.constant dense<0.000000e+00> : vector<8x128xf32>
    %38 = tpu.matmul %36, %37, %cst_7 {dimension_numbers = #tpu.dot_dimension_numbers<[1], [0], [0], [1], [0, 0, 1, 1], [], []>} : vector<8x128xbf16>, vector<128x128xbf16>, vector<8x128xf32> -> vector<8x128xf32>
    %c0_8 = arith.constant 0 : index
    %c0_9 = arith.constant 0 : index
    %39 = vector.load %arg5[%c0_8, %c0_9] : memref<1x128xf32, #tpu.memory_space<vmem>>, vector<1x128xf32>
    %40 = vector.broadcast %39 : vector<1x128xf32> to vector<8x128xf32>
    %41 = arith.addf %38, %40 : vector<8x128xf32>
    %cst_10 = arith.constant 0.000000e+00 : f32
    %42 = vector.broadcast %cst_10 : f32 to vector<8x128xf32>
    %43 = arith.maximumf %41, %42 : vector<8x128xf32>
    %44 = arith.truncf %43 : vector<8x128xf32> to vector<8x128xbf16>
    %c0_11 = arith.constant 0 : index
    %c0_12 = arith.constant 0 : index
    %45 = vector.load %arg6[%c0_11, %c0_12] : memref<128x8xbf16, #tpu.memory_space<vmem>>, vector<128x8xbf16>
    %cst_13 = arith.constant dense<0.000000e+00> : vector<8x8xf32>
    %46 = tpu.matmul %44, %45, %cst_13 {dimension_numbers = #tpu.dot_dimension_numbers<[1], [0], [0], [1], [0, 0, 1, 1], [], []>} : vector<8x128xbf16>, vector<128x8xbf16>, vector<8x8xf32> -> vector<8x8xf32>
    %c0_14 = arith.constant 0 : index
    %c0_15 = arith.constant 0 : index
    %47 = vector.load %arg7[%c0_14, %c0_15] : memref<1x8xf32, #tpu.memory_space<vmem>>, vector<1x8xf32>
    %48 = vector.broadcast %47 : vector<1x8xf32> to vector<8x8xf32>
    %49 = arith.addf %46, %48 : vector<8x8xf32>
    %c0_16 = arith.constant 0 : index
    %c0_17 = arith.constant 0 : index
    %50 = vector.load %arg8[%c0_16, %c0_17] : memref<8x8xf32, #tpu.memory_space<vmem>>, vector<8x8xf32>
    tpu.vector_store %arg8[%c0_16, %c0_17], %49 {strides = array<i32>} : memref<8x8xf32, #tpu.memory_space<vmem>>, vector<8x8xf32>,
    return
  }
  func.func @transform_0(%arg0: i32) -> (i32, i32) {
    %c0_i32 = arith.constant 0 : i32
    %c0_i32_0 = arith.constant 0 : i32
    return %arg0, %c0_i32 : i32, i32
  }
  func.func @transform_1(%arg0: i32) -> (i32, i32) {
    %c0_i32 = arith.constant 0 : i32
    %c0_i32_0 = arith.constant 0 : i32
    %c0_i32_1 = arith.constant 0 : i32
    return %c0_i32, %c0_i32_0 : i32, i32
  }
  func.func @transform_2(%arg0: i32) -> (i32, i32) {
    %c0_i32 = arith.constant 0 : i32
    %c0_i32_0 = arith.constant 0 : i32
    %c0_i32_1 = arith.constant 0 : i32
    return %c0_i32, %c0_i32_0 : i32, i32
  }
  func.func @transform_3(%arg0: i32) -> (i32, i32) {
    %c0_i32 = arith.constant 0 : i32
    %c0_i32_0 = arith.constant 0 : i32
    %c0_i32_1 = arith.constant 0 : i32
    return %c0_i32, %c0_i32_0 : i32, i32
  }
  func.func @transform_4(%arg0: i32) -> (i32, i32) {
    %c0_i32 = arith.constant 0 : i32
    %c0_i32_0 = arith.constant 0 : i32
    %c0_i32_1 = arith.constant 0 : i32
    return %c0_i32, %c0_i32_0 : i32, i32
  }
  func.func @transform_5(%arg0: i32) -> (i32, i32) {
    %c0_i32 = arith.constant 0 : i32
    %c0_i32_0 = arith.constant 0 : i32
    %c0_i32_1 = arith.constant 0 : i32
    return %c0_i32, %c0_i32_0 : i32, i32
  }
  func.func @transform_6(%arg0: i32) -> (i32, i32) {
    %c0_i32 = arith.constant 0 : i32
    %c0_i32_0 = arith.constant 0 : i32
    %c0_i32_1 = arith.constant 0 : i32
    return %c0_i32, %c0_i32_0 : i32, i32
  }
  func.func @transform_7(%arg0: i32) -> (i32, i32) {
    %c0_i32 = arith.constant 0 : i32
    %c0_i32_0 = arith.constant 0 : i32
    return %arg0, %c0_i32 : i32, i32
  }
}

</mosaic_0001>

<bundles_post_ra>
// kernel: tpu_custom_call.1
= control target key start
LH: loop header
LB: loop body
LE: loop exit
PB: predicated region body
PF: predicated region fallthrough
CT: control target
= control target key end

     0   :  { %12 = vsyncpa [#allocation3], 0  ;;  %s665_s0 = inlined_call_operand.vmem [shape: f32[8,8], index: 0, kind: input, shape index: {}]   ;;  %s666_s1 = inlined_call_operand.hbm [shape: f32[8,128], index: 1, kind: input, shape index: {}]   ;;  %s667_s2 = inlined_call_operand.vmem [shape: f32[1,128], index: 2, kind: input, shape index: {}]   ;;  %s668_s3 = inlined_call_operand.vmem [shape: bf16[128,128], index: 3, kind: input, shape index: {}]   ;;  %s669_s4 = inlined_call_operand.hbm [shape: f32[1,128], index: 4, kind: input, shape index: {}]   ;;  %s670_s5 = inlined_call_operand.vmem [shape: bf16[128,8], index: 5, kind: input, shape index: {}]   ;;  %s671_s6 = inlined_call_operand.vmem [shape: f32[1,8], index: 6, kind: input, shape index: {}]   ;;  %s672_s7 = inlined_call_operand.hbm [shape: f32[8,8], index: 7, kind: output, shape index: {}]  }
   0x1   :  { %13 = vsyncpa [#allocation6], 0 }
   0x2   :  { %14 = vsyncpa [#allocation4], 0  ;;  %s531_s24 = smov [#allocation2]   ;;  %s532_s26 = smov [#allocation5]  }
   0x3   :  { %s23_s25 = sshll.u32 %s531_s24, 4  ;;  %s37_s27 = sshll.u32 %s532_s26, 4  ;;  %s24_s25 = int_to_ptr.vmem [resolvable:$true] %s23_s25  ;;  %s38_s27 = int_to_ptr.vmem [resolvable:$true] %s37_s27 }
   0x4   :  { %s473_s28 = scalar_lea.vmem %s24_s25, 128  ;;  %p478_p1 = scmp.lt.s32.totalorder %s24_s25, %s24_s25 }
   0x5   :  { %p474_p0 = scmp.ne.s32.totalorder %s24_s25, %s473_s28  ;;  %p479_p2 = scmp.lt.s32.totalorder %s473_s28, %s473_s28 }
   0x7   :  { %p480_p3 = por %p479_p2, %p478_p1 }
   0x9   :  { %p481_p4 = pnand %p480_p3, %p474_p0 }
   0xb   :  { %484 = shalt.err (!%p481_p4)
}
   0xc   :  { %26 = dma.hbm_to_vmem [thread:$0]  %s666_s1, 128, %s24_s25, [#allocation3]  }
   0xd   :  { %s493_s8 = scalar_lea.vmem %s38_s27, 16  ;;  %s497_s9 = scalar_lea.vmem %s38_s27, 32 }
   0xe   :  { %p494_p5 = scmp.ne.s32.totalorder %s38_s27, %s493_s8  ;;  %p498_p6 = scmp.lt.s32.totalorder %s38_s27, %s38_s27 }
   0xf   :  { %p499_p7 = scmp.lt.s32.totalorder %s497_s9, %s493_s8 }
  0x11   :  { %p500_p8 = por %p499_p7, %p498_p6 }
  0x13   :  { %p501_p9 = pnand %p500_p8, %p494_p5 }
  0x15   :  { %504 = shalt.err (!%p501_p9)
}
  0x16   :  { %40 = dma.hbm_to_vmem [thread:$0]  %s669_s4, 16, %s38_s27, [#allocation6]  }
  0x17   :  { %525 = dma.done.wait [#allocation3], 128  }
  0x18   :  { %526 = vsyncadd [#allocation3], 4294967168 }
  0x19   :  { %527 = dma.done.wait [#allocation6], 16  }
  0x1a   :  { %528 = vsyncadd [#allocation6], 4294967280  ;;  %v533_v0 = vmov 0   ;;  %v534_v1 = vmov 2   ;;  %v535_v2 = vmov 0.0   ;;  %v52_v3 = vld [vmem:[%s665_s0] sm:$0xff]  ;;  %v59_v21 = vlaneseq }
  0x1b   :  { %443 = vset.pattern.permute.xlu0 %v533_v0  ;;  %445 = vset.pattern.permute.xlu1 %v534_v1  ;;  %v449_v4 = vld [vmem:[%s668_s3 + $0x38] sm:$0xff]   ;;  %v450_v5 = vld [vmem:[%s668_s3 + $0x30] sm:$0xff]   ;;  %v536_v6 = vmov 1   ;;  %v537_v7 = vmov 3   ;;  %v451_v8 = vld [vmem:[%s668_s3 + $0x28] sm:$0xff]   ;;  %v538_v10 = vmov 4  }
  0x1c   :  { %393 = vmatprep.subr.bf16.mxu0 %v535_v2  ;;  %413 = vmatprep.subr.bf16.mxu1 %v535_v2  ;;  %v452_v9 = vld [vmem:[%s668_s3 + $0x20] sm:$0xff]   ;;  %vm539_vm0 = vmmov 0   ;;  %v453_v11 = vld [vmem:[%s668_s3 + $0x18] sm:$0xff]   ;;  %v454_v13 = vld [vmem:[%s668_s3 + $0x10] sm:$0xff]   ;;  %v60_v22 = vshrl.u32 %v59_v21, 7  ;;  %s540_s19 = smov [#allocation7]  }
  0x1d   :  { %56 = vperm.xlu0 %443, %v52_v3   ;;  %75 = vperm.xlu1 %445, %v52_v3   ;;  %v457_v12 = vld [vmem:[%s670_s5 + $0x38] sm:$0xff]   ;;  %v458_v14 = vld [vmem:[%s670_s5 + $0x30] sm:$0xff]   ;;  %v455_v15 = vld [vmem:[%s668_s3 + $0x8] sm:$0xff]   ;;  %s346_s20 = sshll.u32 %s540_s19, 4  ;;  %vm338_vm1 = vcmask 64512   ;;  %s347_s20 = int_to_ptr.vmem [resolvable:$true] %s346_s20 }
  0x1e   :  { %394 = vmatpush3.bf16.msra.mxu0 %v449_v4  ;;  %409 = vmatprep.mubr.msk.bf16.mxu0 %vm539_vm0, %v535_v2  ;;  %v459_v16 = vld [vmem:[%s670_s5 + $0x28] sm:$0xff]   ;;  %v456_v17 = vld [vmem:[%s668_s3] sm:$0xff]   ;;  %v461_v19 = vld [vmem:[%s670_s5 + $0x18] sm:$0xff]   ;;  %v61_v23 = vsub.s32 0, %v60_v22  ;;  %v70_v24 = vsub.s32 1, %v60_v22  ;;  %v80_v27 = vsub.s32 2, %v60_v22  ;;  %p510_p11 = scmp.lt.s32.totalorder %s347_s20, %s347_s20 }
  0x1f   :  { %395 = vmatprep.subr.bf16.mxu0 %v535_v2  ;;  %429 = vmatprep.mubr.msk.bf16.mxu1 %vm539_vm0, %v535_v2  ;;  %v460_v18 = vld [vmem:[%s670_s5 + $0x20] sm:$0xff]   ;;  %v462_v20 = vld [vmem:[%s670_s5 + $0x10] sm:$0xff]   ;;  %v90_v31 = vsub.s32 3, %v60_v22  ;;  %v100_v32 = vsub.s32 4, %v60_v22  ;;  %v463_v52 = vld [vmem:[%s670_s5 + $0x8] sm:$0xff]  }
  0x20   :  { %414 = vmatpush3.bf16.msra.mxu1 %v457_v12  ;;  %v53_v25 = vld [vmem:[#allocation2] sm:$0xff]  ;;  %v357_v54 = vld [vmem:[#allocation5] ss:$0 sm:$0xff] }
  0x21   :  { %444 = vset.pattern.permute.xlu0 %v536_v6  ;;  %446 = vset.pattern.permute.xlu1 %v537_v7  ;;  %v62_v29 = vrot.slane %v53_v25, %v61_v23  ;;  %v71_v30 = vrot.slane %v53_v25, %v70_v24  ;;  %v81_v33 = vrot.slane %v53_v25, %v80_v27  ;;  %v356_v47 = vld [vmem:[%s667_s2] ss:$0 sm:$0xff] }
  0x22   :  { %65 = vperm.xlu0 %444, %v52_v3   ;;  %85 = vperm.xlu1 %446, %v52_v3   ;;  %v91_v38 = vrot.slane %v53_v25, %v90_v31  ;;  %v101_v39 = vrot.slane %v53_v25, %v100_v32  ;;  %v464_v53 = vld [vmem:[%s670_s5] sm:$0xff]   ;;  %s505_s5 = scalar_lea.vmem %s347_s20, 128 }
  0x23   :  { %396 = vmatpush3.bf16.msra.mxu0 %v450_v5  ;;  %415 = vmatprep.subr.bf16.mxu1 %v535_v2  ;;  %v366_v62 = vld [vmem:[%s671_s6] ss:$0 sm:$0xff]  ;;  %p506_p10 = scmp.ne.s32.totalorder %s347_s20, %s505_s5  ;;  %p511_p12 = scmp.lt.s32.totalorder %s505_s5, %s505_s5 }
  0x24   :  { %397 = vmatprep.subr.bf16.mxu0 %v535_v2  ;;  %416 = vmatpush3.bf16.msra.mxu1 %v458_v14 }
  0x25   :  { %417 = vmatprep.subr.bf16.mxu1 %v535_v2  ;;  %p512_p13 = por %p511_p12, %p510_p11 }
  0x26   :  { %447 = vset.pattern.permute.xlu1 %v538_v10  ;;  %448 = vset.pattern.permute.xlu0 %v538_v10 }
  0x27   :  { %95 = vperm.xlu1 %447, %v52_v3   ;;  %398 = vmatpush3.bf16.msra.mxu0 %v451_v8  ;;  %p513_p0 = pnand %p512_p13, %p506_p10 }
  0x28   :  { %399 = vmatprep.subr.bf16.mxu0 %v535_v2  ;;  %418 = vmatpush3.bf16.msra.mxu1 %v459_v16 }
  0x29   :  { %419 = vmatprep.subr.bf16.mxu1 %v535_v2 }
  0x2b   :  { %400 = vmatpush3.bf16.msra.mxu0 %v452_v9 }
  0x2c   :  { %401 = vmatprep.subr.bf16.mxu0 %v535_v2  ;;  %420 = vmatpush3.bf16.msra.mxu1 %v460_v18 }
  0x2d   :  { %421 = vmatprep.subr.bf16.mxu1 %v535_v2 }
  0x2f   :  { %402 = vmatpush3.bf16.msra.mxu0 %v453_v11 }
  0x30   :  { %403 = vmatprep.subr.bf16.mxu0 %v535_v2  ;;  %422 = vmatpush3.bf16.msra.mxu1 %v461_v19 }
  0x31   :  { %423 = vmatprep.subr.bf16.mxu1 %v535_v2 }
  0x33   :  { %404 = vmatpush3.bf16.msra.mxu0 %v454_v13 }
  0x34   :  { %405 = vmatprep.subr.bf16.mxu0 %v535_v2  ;;  %424 = vmatpush3.bf16.msra.mxu1 %v462_v20 }
  0x35   :  { %425 = vmatprep.subr.bf16.mxu1 %v535_v2 }
  0x37   :  { %406 = vmatpush3.bf16.msra.mxu0 %v455_v15 }
  0x38   :  { %407 = vmatprep.subr.bf16.mxu0 %v535_v2  ;;  %426 = vmatpush3.bf16.msra.mxu1 %v463_v52 }
  0x39   :  { %427 = vmatprep.subr.bf16.mxu1 %v535_v2 }
  0x3b   :  { %408 = vmatpush3.bf16.msra.mxu0 %v456_v17 }
  0x3c   :  { %428 = vmatpush3.bf16.msra.mxu1 %v464_v53 }
  0x98   :  { %v57_v26 = vpop.permute.xlu0 %56  ;;  %v76_v28 = vpop.permute.xlu1 %75 }
  0x99   :  { %v63_v36 = vmul.f32 %v62_v29, %v57_v26  ;;  %v82_v40 = vmul.f32 %v81_v33, %v76_v28 }
  0x9d   :  { %v66_v34 = vpop.permute.xlu0 %65  ;;  %v86_v35 = vpop.permute.xlu1 %85 }
  0x9e   :  { %v72_v37 = vmul.f32 %v71_v30, %v66_v34  ;;  %v92_v43 = vmul.f32 %v91_v38, %v86_v35 }
  0xa0   :  { %v73_v41 = vadd.f32 %v72_v37, %v63_v36 }
  0xa2   :  { %v83_v42 = vadd.f32 %v82_v40, %v73_v41  ;;  %v96_v44 = vpop.permute.xlu1 %95 }
  0xa3   :  { %v102_v45 = vmul.f32 %v101_v39, %v96_v44 }
  0xa4   :  { %v93_v46 = vadd.f32 %v92_v43, %v83_v42 }
  0xa6   :  { %v103_v48 = vadd.f32 %v102_v45, %v93_v46 }
  0xa8   :  { %v111_v49 = vadd.f32 %v356_v47, %v103_v48 }
  0xaa   :  { %v112_v50 = vmax.f32 %v111_v49, 0.0 }
  0xac   :  { %v113_v51 = vpack.c.bf16 %v112_v50, %v112_v50 }
  0xae   :  { %410 = vmatmul.mubr.bf16.vlgmr.msra.gmra.mxu0 %v113_v51 }
 0x16e   :  { %v219_v55 = vpop.f32.mrf.mxu0 }
 0x16f   :  { %v220_v56 = vadd.f32 %v357_v54, %v219_v55 }
 0x170   :  { %v411_v57 = vpop.f32.mrf.mxu0 }
 0x171   :  { %v225_v58 = vmax.f32 %v220_v56, 0.0 }
 0x172   :  { %v222_v59 = vpop.f32.mrf.mxu0 }
 0x173   :  { %v226_v60 = vpack.c.bf16 %v225_v58, %v225_v58 }
 0x174   :  { %v412_v61 = vpop.f32.mrf.mxu0 }
 0x175   :  { %430 = vmatmul.mubr.bf16.vlgmr.msra.gmra.mxu1 %v226_v60 }
 0x235   :  { %v332_v63 = vpop.f32.mrf.mxu1 }
 0x236   :  { %v333_v0 = vadd.f32 %v366_v62, %v332_v63 }
 0x237   :  { %v431_v1 = vpop.f32.mrf.mxu1 }
 0x238   :  { %339 = vst.msk [vmem:[#allocation7] sm:$0xff] %vm338_vm1, %v333_v0 }
 0x239   :  { %v335_v2 = vpop.f32.mrf.mxu1 }
 0x23a   :  { %516 = shalt.err (!%p513_p0)
}
 0x23b   :  { %349 = dma.vmem_to_hbm [thread:$0]  %s347_s20, 128, %s672_s7, [#allocation4]   ;;  %v432_v3 = vpop.f32.mrf.mxu1 }
 0x23c   :  { %529 = dma.done.wait [#allocation4], 128  }
 0x23d   :  { %530 = vsyncadd [#allocation4], 4294967168 }
 0x23e   :  { %353 = vsyncpa [#allocation3], 1 }
 0x23f   :  { %354 = vsyncpa [#allocation6], 1 }
 0x240   :  { %355 = vsyncpa [#allocation4], 1 }

</bundles_post_ra>
